<compile_context>
chip_gen: v5e
topology: v5e:2x2
jax: 0.10.0
libtpu: 0.0.40
codegen_flags: <defaults>
</compile_context>

<pallas_src>
import jax
import jax.numpy as jnp
from jax import lax
from jax.experimental import pallas as pl
from jax.experimental.pallas import tpu as pltpu

_LANE = 128
_VMEM_LIMIT = 32 * 1024 * 1024   # safe scoped-VMEM request on v5e/v6e/v7x


def _pick_hw_tile(B, C, HW, itemsize, target_block_bytes=2 * 1024 * 1024):
    """Spatial (lane) tile: multiple of 128 lanes, sized for ~2 MiB streaming blocks."""
    max_tile = pl.cdiv(HW, _LANE) * _LANE
    t = target_block_bytes // max(1, B * C * itemsize)
    t = max(_LANE, (t // _LANE) * _LANE)
    return int(min(t, max_tile))


# ----------------------------------------------------------------------------
# Kernel 1: siASB = Conv2d(3x3, stride=1, pad=1) + folded BatchNorm2d + Sigmoid
# Fused-tap formulation: one padded copy of x, 9 lane-shifted views, 9 MXU dots.
# Output emitted lane-dense as (B, Cout, H*W).
# ----------------------------------------------------------------------------
def _make_conv_kernel(Cout, K, W, HW, chunk):
    bases = list(range(0, HW, chunk))

    def kernel(x_ref, wt_ref, shift_ref, lm_ref, rm_ref, o_ref):
        # x_ref : (Cin, (H+2)*W + 2)  row-padded, flat-padded-by-1 input (one batch)
        # wt_ref: (K*K, Cout, Cin)    conv taps with the BN scale folded in
        # shift : (Cout, 1)           folded conv-bias + BN shift
        # lm/rm : (1, HW)             0 where output col == 0 / == W-1
        # o_ref : (Cout, HW)          darken, lane-dense spatial layout
        shift = shift_ref[...]
        for base in bases:                       # static loop: bounds vreg pressure
            L = min(chunk, HW - base)
            lm = lm_ref[:, base:base + L]
            rm = rm_ref[:, base:base + L]
            acc = jnp.zeros((Cout, L), jnp.float32)
            for kh in range(K):
                for kw in range(K):
                    s = kh * W + kw              # lane shift of this tap
                    rhs = x_ref[:, base + s:base + s + L]
                    if kw == 0:
                        rhs = rhs * lm           # zero the wrapped left-border column
                    elif kw == K - 1:
                        rhs = rhs * rm           # zero the wrapped right-border column
                    acc = acc + jnp.dot(wt_ref[kh * K + kw], rhs,
                                        preferred_element_type=jnp.float32)
            o_ref[:, base:base + L] = jax.nn.sigmoid(acc + shift).astype(o_ref.dtype)

    return kernel


def conv_bn_sigmoid(x_nchw, w_conv, b_conv, bn_gamma, bn_beta, bn_mean, bn_var,
                    *, eps=1e-5, chunk=1024):
    """x: (B, Cin, H, W); w: (Cout, Cin, 3, 3) (PyTorch). Returns darken (B, Cout, H*W)."""
    B, Cin, H, W = x_nchw.shape
    Cout, _, K, Kw = w_conv.shape
    assert K == 3 and Kw == 3, "fused-tap conv assumes kernel_size=3 with padding=1 ('same')"
    # TODO(synk): other kernel_size values (the module allows them with padding=1) would
    #             need a general halo / im2col path; ASAN instantiates kernel_size=3.
    HW = H * W
    flat_len = (H + 2) * W + 2

    # Wrapper-side layout plumbing (single 1x copy, no 9x im2col):
    # pad rows by 1, flatten spatial, pad the flat axis by 1 (absorbs the kw-1 shift).
    xp = jnp.pad(x_nchw, ((0, 0), (0, 0), (1, 1), (0, 0))).reshape(B, Cin, (H + 2) * W)
    xflat = jnp.pad(xp, ((0, 0), (0, 0), (1, 1)))

    scale = (bn_gamma / jnp.sqrt(bn_var + eps)).astype(jnp.float32)            # (Cout,)
    wt = (jnp.transpose(w_conv, (2, 3, 0, 1)).reshape(K * K, Cout, Cin)
          .astype(jnp.float32) * scale[None, :, None])                         # BN scale folded
    shift = ((b_conv - bn_mean) * scale + bn_beta).reshape(Cout, 1).astype(jnp.float32)

    col = jnp.arange(HW, dtype=jnp.int32) % W
    lmask = (col != 0).astype(x_nchw.dtype).reshape(1, HW)
    rmask = (col != W - 1).astype(x_nchw.dtype).reshape(1, HW)

    if HW > chunk:
        chunk = max(_LANE, (chunk // _LANE) * _LANE)
    else:
        chunk = HW

    itemsize = jnp.dtype(x_nchw.dtype).itemsize
    darken = pl.pallas_call(
        _make_conv_kernel(Cout, K, W, HW, chunk),
        out_shape=jax.ShapeDtypeStruct((B, Cout, HW), x_nchw.dtype),
        grid=(B,),
        in_specs=[
            pl.BlockSpec((None, Cin, flat_len), lambda b: (b, 0, 0)),
            pl.BlockSpec((K * K, Cout, Cin), lambda b: (0, 0, 0)),
            pl.BlockSpec((Cout, 1), lambda b: (0, 0)),
            pl.BlockSpec((1, HW), lambda b: (0, 0)),
            pl.BlockSpec((1, HW), lambda b: (0, 0)),
        ],
        out_specs=pl.BlockSpec((None, Cout, HW), lambda b: (b, 0, 0)),
        compiler_params=pltpu.CompilerParams(
            dimension_semantics=("parallel",),
            vmem_limit_bytes=_VMEM_LIMIT),
        cost_estimate=pl.CostEstimate(
            flops=2 * B * HW * K * K * Cin * Cout,
            transcendentals=B * HW * Cout,
            bytes_accessed=B * (Cin * flat_len + Cout * HW) * itemsize),
    )(xflat, wt, shift, lmask, rmask)
    return darken


# ----------------------------------------------------------------------------
# Kernel 2: fused spatial min/max reduction + both excitation MLPs (siMASE/siMISE)
# ----------------------------------------------------------------------------
def _make_anb_stats_kernel(B, C, hw_total, hw_tile):
    needs_mask = (hw_total % hw_tile) != 0
    n_sub = hw_tile // _LANE

    def kernel(x_ref,
               w1h_ref, b1h_ref, w2h_ref, b2h_ref,
               w1l_ref, b1l_ref, w2l_ref, b2l_ref,
               imh_ref, iml_ref, a_ref, c_ref,
               minacc, maxacc):
        k = pl.program_id(0)
        last = pl.num_programs(0) - 1

        @pl.when(k == 0)
        def _init():
            minacc[...] = jnp.full(minacc.shape, jnp.inf, minacc.dtype)
            maxacc[...] = jnp.full(maxacc.shape, -jnp.inf, maxacc.dtype)

        def reduce_block(masked):
            if masked:
                lane = lax.broadcasted_iota(jnp.int32, (B, C, _LANE), 2)
                base = k * hw_tile

            def accum(chunk, off, mn, mx):
                chunk = chunk.astype(jnp.float32)
                if masked:
                    valid = (base + off + lane) < hw_total
                    cmn = jnp.where(valid, chunk, jnp.inf)
                    cmx = jnp.where(valid, chunk, -jnp.inf)
                else:
                    cmn = cmx = chunk
                return jnp.minimum(mn, cmn), jnp.maximum(mx, cmx)

            mn, mx = minacc[...], maxacc[...]
            if n_sub <= 8:
                for j in range(n_sub):            # fully static path (small tiles)
                    chunk = x_ref[:, :, j * _LANE:(j + 1) * _LANE]
                    mn, mx = accum(chunk, j * _LANE, mn, mx)
            else:
                def body(j, carry):
                    off = pl.multiple_of(j * _LANE, _LANE)
                    chunk = x_ref[:, :, pl.ds(off, _LANE)]
                    return accum(chunk, off, *carry)
                mn, mx = lax.fori_loop(0, n_sub, body, (mn, mx), unroll=8)
            minacc[...] = mn
            maxacc[...] = mx

        if needs_mask:
            @pl.when(k != last)
            def _hot():                            # hot path: no tail mask
                reduce_block(False)

            @pl.when(k == last)
            def _tail():                           # tail mask only on the last step
                reduce_block(True)
        else:
            reduce_block(False)

        @pl.when(k == last)
        def _finalize():
            pooled_max = jnp.max(maxacc[...], axis=-1)   # (B, C): single XLU reduce
            pooled_min = jnp.min(minacc[...], axis=-1)

            def excite(p, w1, b1, w2, b2):
                # tiny MLP, runs once -> off the hot path
                h = jnp.maximum(
                    jnp.dot(p, w1[...], preferred_element_type=jnp.float32) + b1[...], 0.0)
                return jax.nn.sigmoid(
                    jnp.dot(h, w2[...], preferred_element_type=jnp.float32) + b2[...])

            imh = excite(pooled_max, w1h_ref, b1h_ref, w2h_ref, b2h_ref)
            iml = excite(pooled_min, w1l_ref, b1l_ref, w2l_ref, b2l_ref)
            imh_ref[...] = imh.astype(imh_ref.dtype)
            iml_ref[...] = iml.astype(iml_ref.dtype)
            inv = 1.0 / jnp.maximum(imh - iml, 1e-5)     # once per call: exact divide
            a_ref[...] = inv.astype(a_ref.dtype)
            c_ref[...] = (-iml * inv).astype(c_ref.dtype)

    return kernel


# ----------------------------------------------------------------------------
# Kernel 3: siANB normalize  out = clip(x * a + c, 0, 1)   (divide pre-folded)
# ----------------------------------------------------------------------------
def _anb_norm_kernel(x_ref, a_ref, c_ref, o_ref):
    x = x_ref[...].astype(jnp.float32)                  # (B, C, hw_tile)
    o_ref[...] = jnp.clip(x * a_ref[...] + c_ref[...], 0.0, 1.0).astype(o_ref.dtype)


def anb_block(d_flat, mase_params, mise_params, *, hw_tile=None):
    """siANB on darken features d (B, C, HW). Returns (out_flat, im_h, im_l)."""
    B, C, HW = d_flat.shape
    itemsize = jnp.dtype(d_flat.dtype).itemsize
    if hw_tile is None:
        hw_tile = _pick_hw_tile(B, C, HW, itemsize)
    assert hw_tile % _LANE == 0
    n_steps = pl.cdiv(HW, hw_tile)

    w1h, b1h, w2h, b2h = mase_params
    w1l, b1l, w2l, b2l = mise_params

    def full(a):
        return pl.BlockSpec(a.shape, lambda k: (0,) * a.ndim)

    x_spec = pl.BlockSpec((B, C, hw_tile), lambda k: (0, 0, k))
    bc_spec = pl.BlockSpec((B, C), lambda k: (0, 0))

    # pass 1: fused min/max reduction over H*W + both excitation MLPs + (a, c) folding
    imh, iml, a_bc, c_bc = pl.pallas_call(
        _make_anb_stats_kernel(B, C, HW, hw_tile),
        out_shape=(jax.ShapeDtypeStruct((B, C), jnp.float32),) * 4,
        grid=(n_steps,),
        in_specs=[x_spec,
                  full(w1h), full(b1h), full(w2h), full(b2h),
                  full(w1l), full(b1l), full(w2l), full(b2l)],
        out_specs=(bc_spec, bc_spec, bc_spec, bc_spec),
        scratch_shapes=[pltpu.VMEM((B, C, _LANE), jnp.float32),
                        pltpu.VMEM((B, C, _LANE), jnp.float32)],
        compiler_params=pltpu.CompilerParams(
            dimension_semantics=("arbitrary",),        # carries the min/max accumulators
            vmem_limit_bytes=_VMEM_LIMIT),
        cost_estimate=pl.CostEstimate(
            flops=2 * B * C * HW + 8 * B * C * C,
            transcendentals=2 * B * C,
            bytes_accessed=B * C * HW * itemsize + 4 * B * C * 4),
    )(d_flat, w1h, b1h, w2h, b2h, w1l, b1l, w2l, b2l)

    # pass 2: elementwise x*a + c + clip (mem-bound streaming pass, no divide)
    out = pl.pallas_call(
        _anb_norm_kernel,
        out_shape=jax.ShapeDtypeStruct((B, C, HW), d_flat.dtype),
        grid=(n_steps,),
        in_specs=[x_spec,
                  pl.BlockSpec((B, C, 1), lambda k: (0, 0, 0)),
                  pl.BlockSpec((B, C, 1), lambda k: (0, 0, 0))],
        out_specs=x_spec,
        compiler_params=pltpu.CompilerParams(
            dimension_semantics=("parallel",),
            vmem_limit_bytes=_VMEM_LIMIT),
        cost_estimate=pl.CostEstimate(
            flops=4 * B * C * HW,
            transcendentals=0,
            bytes_accessed=2 * B * C * HW * itemsize),
    )(d_flat, a_bc.reshape(B, C, 1), c_bc.reshape(B, C, 1))

    return out, imh, iml


def asan_forward(x, params, *, hw_tile=None, return_intermediates=False):
    B, Cin, H, W = x.shape
    darken_flat = conv_bn_sigmoid(x, params["conv_w"], params["conv_b"],
                                  params["bn_gamma"], params["bn_beta"],
                                  params["bn_mean"], params["bn_var"])
    out_flat, imh, iml = anb_block(darken_flat, params["mase"], params["mise"],
                                   hw_tile=hw_tile)
    Cout = darken_flat.shape[1]
    out = out_flat.reshape(B, Cout, H, W)
    if return_intermediates:
        return out, darken_flat.reshape(B, Cout, H, W), imh, iml
    return out


# ----------------------------------------------------------------------------
# Deterministic synthetic parameters + pure-JAX reference
# ----------------------------------------------------------------------------
def init_params(key, in_channels, out_channels, kernel_size=3, r=1, dtype=jnp.float32):
    hidden = out_channels // r
    ks = jax.random.split(key, 16)

    def lin(ki, fi, fo):                       # PyTorch Linear weight is (out,in); stored transposed
        return jax.random.normal(ki, (fi, fo), dtype) / jnp.sqrt(float(fi))

    return {
        "conv_w": jax.random.normal(ks[0], (out_channels, in_channels,
                                            kernel_size, kernel_size), dtype) * 0.3,
        "conv_b": jax.random.normal(ks[1], (out_channels,), dtype) * 0.1,
        "bn_gamma": 1.0 + 0.1 * jax.random.normal(ks[2], (out_channels,), dtype),
        "bn_beta": 0.1 * jax.random.normal(ks[3], (out_channels,), dtype),
        "bn_mean": 0.1 * jax.random.normal(ks[4], (out_channels,), dtype),
        "bn_var": 1.0 + 0.5 * jnp.abs(jax.random.normal(ks[5], (out_channels,), dtype)),
        "mase": (lin(ks[6], out_channels, hidden),
                 0.1 * jax.random.normal(ks[7], (1, hidden), dtype),
                 lin(ks[8], hidden, out_channels),
                 0.1 * jax.random.normal(ks[9], (1, out_channels), dtype)),
        "mise": (lin(ks[10], out_channels, hidden),
                 0.1 * jax.random.normal(ks[11], (1, hidden), dtype),
                 lin(ks[12], hidden, out_channels),
                 0.1 * jax.random.normal(ks[13], (1, out_channels), dtype)),
    }


def asan_reference(x, params, eps=1e-5):
    d = jax.lax.conv_general_dilated(
        x, params["conv_w"], window_strides=(1, 1), padding=((1, 1), (1, 1)),
        dimension_numbers=("NCHW", "OIHW", "NCHW"))
    d = d + params["conv_b"][None, :, None, None]
    d = (d - params["bn_mean"][None, :, None, None]) / jnp.sqrt(
        params["bn_var"][None, :, None, None] + eps)
    d = d * params["bn_gamma"][None, :, None, None] + params["bn_beta"][None, :, None, None]
    d = jax.nn.sigmoid(d)

    def excite(p, w1, b1, w2, b2):
        return jax.nn.sigmoid(jnp.maximum(p @ w1 + b1, 0.0) @ w2 + b2)

    im_h = excite(jnp.max(d, axis=(2, 3)), *params["mase"])    # AdaptiveMaxPool2d
    im_l = excite(jnp.min(d, axis=(2, 3)), *params["mise"])    # -maxpool(-x)
    out = jnp.clip((d - im_l[:, :, None, None]) /
                   jnp.maximum(im_h - im_l, 1e-5)[:, :, None, None], 0.0, 1.0)
    return out, d, im_h, im_l


def _check(x, params, hw_tile=None):
    out, dk, imh, iml = asan_forward(x, params, hw_tile=hw_tile, return_intermediates=True)
    jax.block_until_ready(out)
    _, d_r, imh_r, iml_r = asan_reference(x, params)
    assert jnp.allclose(dk, d_r, atol=1e-4), float(jnp.max(jnp.abs(dk - d_r)))
    assert jnp.allclose(imh, imh_r, atol=1e-4)
    assert jnp.allclose(iml, iml_r, atol=1e-4)
    # kernel-3 check against its own (verified) inputs: exact up to fp reassociation
    norm = jnp.clip((dk - iml[:, :, None, None]) /
                    jnp.maximum(imh - iml, 1e-5)[:, :, None, None], 0.0, 1.0)
    assert jnp.allclose(out, norm, atol=1e-5)
    return out


if __name__ == "__main__":
    key = jax.random.PRNGKey(0)
    kx, kp, kx2 = jax.random.split(key, 3)

    # ASAN(input_size=4, output_size=8, kernel_size=3), small input (B=2, 16x16)
    B, Cin, Cout, H, W = 2, 4, 8, 16, 16
    params = init_params(kp, Cin, Cout, kernel_size=3, r=1)

    x = jax.random.uniform(kx, (B, Cin, H, W), jnp.float32)
    out = _check(x, params)                       # auto hw_tile (single spatial block)
    assert out.shape == (B, Cout, H, W)

    # odd spatial size + forced small hw_tile exercises the multi-step running
    # min/max accumulator, the last-step-only +/-inf tail mask, and ragged conv chunks.
    x2 = jax.random.uniform(kx2, (B, Cin, 13, 11), jnp.float32)
    out2 = _check(x2, params, hw_tile=128)
    assert out2.shape == (B, Cout, 13, 11)

    print("KERNEL_OK")
</pallas_src>

<mosaic_0001>
module attributes {stable_mosaic.version = 11 : i64} {
  func.func @kernel(%arg0: i32, %arg1: memref<1x4x290xf32, #tpu.memory_space<vmem>>, %arg2: memref<9x8x4xf32, #tpu.memory_space<vmem>>, %arg3: memref<8x1xf32, #tpu.memory_space<vmem>>, %arg4: memref<1x256xf32, #tpu.memory_space<vmem>>, %arg5: memref<1x256xf32, #tpu.memory_space<vmem>>, %arg6: memref<1x8x256xf32, #tpu.memory_space<vmem>>) attributes {dimension_semantics = [#tpu.dimension_semantics<parallel>], iteration_bounds = array<i64: 2>, scalar_prefetch = 0 : i64, scratch_operands = 0 : i64, tpu.core_type = #tpu.core_type<tc>, window_params = [{transform_indices = @transform_0, window_bounds = array<i64: 1, 4, 290>}, {pipeline_mode = #tpu.pipeline_mode<synchronous>, transform_indices = @transform_1, window_bounds = array<i64: 9, 8, 4>}, {pipeline_mode = #tpu.pipeline_mode<synchronous>, transform_indices = @transform_2, window_bounds = array<i64: 8, 1>}, {pipeline_mode = #tpu.pipeline_mode<synchronous>, transform_indices = @transform_3, window_bounds = array<i64: 1, 256>}, {pipeline_mode = #tpu.pipeline_mode<synchronous>, transform_indices = @transform_4, window_bounds = array<i64: 1, 256>}, {transform_indices = @transform_5, window_bounds = array<i64: 1, 8, 256>}]} {
    %c0 = arith.constant 0 : index
    %c0_0 = arith.constant 0 : index
    %0 = vector.load %arg3[%c0, %c0_0] : memref<8x1xf32, #tpu.memory_space<vmem>>, vector<8x1xf32>
    %c0_1 = arith.constant 0 : index
    %c0_2 = arith.constant 0 : index
    %1 = vector.load %arg4[%c0_1, %c0_2] : memref<1x256xf32, #tpu.memory_space<vmem>>, vector<1x256xf32>
    %c0_3 = arith.constant 0 : index
    %c0_4 = arith.constant 0 : index
    %2 = vector.load %arg5[%c0_3, %c0_4] : memref<1x256xf32, #tpu.memory_space<vmem>>, vector<1x256xf32>
    %cst = arith.constant 0.000000e+00 : f32
    %3 = vector.broadcast %cst : f32 to vector<8x256xf32>
    %c0_5 = arith.constant 0 : index
    %c0_6 = arith.constant 0 : index
    %c0_7 = arith.constant 0 : index
    %4 = vector.load %arg1[%c0_5, %c0_6, %c0_7] : memref<1x4x290xf32, #tpu.memory_space<vmem>>, vector<1x4x256xf32>
    %5 = vector.shape_cast %4 : vector<1x4x256xf32> to vector<4x256xf32>
    %6 = vector.broadcast %1 : vector<1x256xf32> to vector<4x256xf32>
    %7 = arith.mulf %5, %6 : vector<4x256xf32>
    %c0_8 = arith.constant 0 : index
    %c0_9 = arith.constant 0 : index
    %c0_10 = arith.constant 0 : index
    %8 = vector.load %arg2[%c0_8, %c0_9, %c0_10] : memref<9x8x4xf32, #tpu.memory_space<vmem>>, vector<1x8x4xf32>
    %9 = vector.shape_cast %8 : vector<1x8x4xf32> to vector<8x4xf32>
    %cst_11 = arith.constant dense<0.000000e+00> : vector<8x256xf32>
    %10 = tpu.matmul %9, %7, %cst_11 {dimension_numbers = #tpu.dot_dimension_numbers<[1], [0], [0], [1], [0, 0, 1, 1], [], []>} : vector<8x4xf32>, vector<4x256xf32>, vector<8x256xf32> -> vector<8x256xf32>
    %11 = arith.addf %3, %10 : vector<8x256xf32>
    %c0_12 = arith.constant 0 : index
    %c0_13 = arith.constant 0 : index
    %c1 = arith.constant 1 : index
    %12 = vector.load %arg1[%c0_12, %c0_13, %c1] : memref<1x4x290xf32, #tpu.memory_space<vmem>>, vector<1x4x256xf32>
    %13 = vector.shape_cast %12 : vector<1x4x256xf32> to vector<4x256xf32>
    %c1_14 = arith.constant 1 : index
    %c0_15 = arith.constant 0 : index
    %c0_16 = arith.constant 0 : index
    %14 = vector.load %arg2[%c1_14, %c0_15, %c0_16] : memref<9x8x4xf32, #tpu.memory_space<vmem>>, vector<1x8x4xf32>
    %15 = vector.shape_cast %14 : vector<1x8x4xf32> to vector<8x4xf32>
    %cst_17 = arith.constant dense<0.000000e+00> : vector<8x256xf32>
    %16 = tpu.matmul %15, %13, %cst_17 {dimension_numbers = #tpu.dot_dimension_numbers<[1], [0], [0], [1], [0, 0, 1, 1], [], []>} : vector<8x4xf32>, vector<4x256xf32>, vector<8x256xf32> -> vector<8x256xf32>
    %17 = arith.addf %11, %16 : vector<8x256xf32>
    %c0_18 = arith.constant 0 : index
    %c0_19 = arith.constant 0 : index
    %c2 = arith.constant 2 : index
    %18 = vector.load %arg1[%c0_18, %c0_19, %c2] : memref<1x4x290xf32, #tpu.memory_space<vmem>>, vector<1x4x256xf32>
    %19 = vector.shape_cast %18 : vector<1x4x256xf32> to vector<4x256xf32>
    %20 = vector.broadcast %2 : vector<1x256xf32> to vector<4x256xf32>
    %21 = arith.mulf %19, %20 : vector<4x256xf32>
    %c2_20 = arith.constant 2 : index
    %c0_21 = arith.constant 0 : index
    %c0_22 = arith.constant 0 : index
    %22 = vector.load %arg2[%c2_20, %c0_21, %c0_22] : memref<9x8x4xf32, #tpu.memory_space<vmem>>, vector<1x8x4xf32>
    %23 = vector.shape_cast %22 : vector<1x8x4xf32> to vector<8x4xf32>
    %cst_23 = arith.constant dense<0.000000e+00> : vector<8x256xf32>
    %24 = tpu.matmul %23, %21, %cst_23 {dimension_numbers = #tpu.dot_dimension_numbers<[1], [0], [0], [1], [0, 0, 1, 1], [], []>} : vector<8x4xf32>, vector<4x256xf32>, vector<8x256xf32> -> vector<8x256xf32>
    %25 = arith.addf %17, %24 : vector<8x256xf32>
    %c0_24 = arith.constant 0 : index
    %c0_25 = arith.constant 0 : index
    %c16 = arith.constant 16 : index
    %26 = vector.load %arg1[%c0_24, %c0_25, %c16] : memref<1x4x290xf32, #tpu.memory_space<vmem>>, vector<1x4x256xf32>
    %27 = vector.shape_cast %26 : vector<1x4x256xf32> to vector<4x256xf32>
    %28 = vector.broadcast %1 : vector<1x256xf32> to vector<4x256xf32>
    %29 = arith.mulf %27, %28 : vector<4x256xf32>
    %c3 = arith.constant 3 : index
    %c0_26 = arith.constant 0 : index
    %c0_27 = arith.constant 0 : index
    %30 = vector.load %arg2[%c3, %c0_26, %c0_27] : memref<9x8x4xf32, #tpu.memory_space<vmem>>, vector<1x8x4xf32>
    %31 = vector.shape_cast %30 : vector<1x8x4xf32> to vector<8x4xf32>
    %cst_28 = arith.constant dense<0.000000e+00> : vector<8x256xf32>
    %32 = tpu.matmul %31, %29, %cst_28 {dimension_numbers = #tpu.dot_dimension_numbers<[1], [0], [0], [1], [0, 0, 1, 1], [], []>} : vector<8x4xf32>, vector<4x256xf32>, vector<8x256xf32> -> vector<8x256xf32>
    %33 = arith.addf %25, %32 : vector<8x256xf32>
    %c0_29 = arith.constant 0 : index
    %c0_30 = arith.constant 0 : index
    %c17 = arith.constant 17 : index
    %34 = vector.load %arg1[%c0_29, %c0_30, %c17] : memref<1x4x290xf32, #tpu.memory_space<vmem>>, vector<1x4x256xf32>
    %35 = vector.shape_cast %34 : vector<1x4x256xf32> to vector<4x256xf32>
    %c4 = arith.constant 4 : index
    %c0_31 = arith.constant 0 : index
    %c0_32 = arith.constant 0 : index
    %36 = vector.load %arg2[%c4, %c0_31, %c0_32] : memref<9x8x4xf32, #tpu.memory_space<vmem>>, vector<1x8x4xf32>
    %37 = vector.shape_cast %36 : vector<1x8x4xf32> to vector<8x4xf32>
    %cst_33 = arith.constant dense<0.000000e+00> : vector<8x256xf32>
    %38 = tpu.matmul %37, %35, %cst_33 {dimension_numbers = #tpu.dot_dimension_numbers<[1], [0], [0], [1], [0, 0, 1, 1], [], []>} : vector<8x4xf32>, vector<4x256xf32>, vector<8x256xf32> -> vector<8x256xf32>
    %39 = arith.addf %33, %38 : vector<8x256xf32>
    %c0_34 = arith.constant 0 : index
    %c0_35 = arith.constant 0 : index
    %c18 = arith.constant 18 : index
    %40 = vector.load %arg1[%c0_34, %c0_35, %c18] : memref<1x4x290xf32, #tpu.memory_space<vmem>>, vector<1x4x256xf32>
    %41 = vector.shape_cast %40 : vector<1x4x256xf32> to vector<4x256xf32>
    %42 = vector.broadcast %2 : vector<1x256xf32> to vector<4x256xf32>
    %43 = arith.mulf %41, %42 : vector<4x256xf32>
    %c5 = arith.constant 5 : index
    %c0_36 = arith.constant 0 : index
    %c0_37 = arith.constant 0 : index
    %44 = vector.load %arg2[%c5, %c0_36, %c0_37] : memref<9x8x4xf32, #tpu.memory_space<vmem>>, vector<1x8x4xf32>
    %45 = vector.shape_cast %44 : vector<1x8x4xf32> to vector<8x4xf32>
    %cst_38 = arith.constant dense<0.000000e+00> : vector<8x256xf32>
    %46 = tpu.matmul %45, %43, %cst_38 {dimension_numbers = #tpu.dot_dimension_numbers<[1], [0], [0], [1], [0, 0, 1, 1], [], []>} : vector<8x4xf32>, vector<4x256xf32>, vector<8x256xf32> -> vector<8x256xf32>
    %47 = arith.addf %39, %46 : vector<8x256xf32>
    %c0_39 = arith.constant 0 : index
    %c0_40 = arith.constant 0 : index
    %c32 = arith.constant 32 : index
    %48 = vector.load %arg1[%c0_39, %c0_40, %c32] : memref<1x4x290xf32, #tpu.memory_space<vmem>>, vector<1x4x256xf32>
    %49 = vector.shape_cast %48 : vector<1x4x256xf32> to vector<4x256xf32>
    %50 = vector.broadcast %1 : vector<1x256xf32> to vector<4x256xf32>
    %51 = arith.mulf %49, %50 : vector<4x256xf32>
    %c6 = arith.constant 6 : index
    %c0_41 = arith.constant 0 : index
    %c0_42 = arith.constant 0 : index
    %52 = vector.load %arg2[%c6, %c0_41, %c0_42] : memref<9x8x4xf32, #tpu.memory_space<vmem>>, vector<1x8x4xf32>
    %53 = vector.shape_cast %52 : vector<1x8x4xf32> to vector<8x4xf32>
    %cst_43 = arith.constant dense<0.000000e+00> : vector<8x256xf32>
    %54 = tpu.matmul %53, %51, %cst_43 {dimension_numbers = #tpu.dot_dimension_numbers<[1], [0], [0], [1], [0, 0, 1, 1], [], []>} : vector<8x4xf32>, vector<4x256xf32>, vector<8x256xf32> -> vector<8x256xf32>
    %55 = arith.addf %47, %54 : vector<8x256xf32>
    %c0_44 = arith.constant 0 : index
    %c0_45 = arith.constant 0 : index
    %c33 = arith.constant 33 : index
    %56 = vector.load %arg1[%c0_44, %c0_45, %c33] : memref<1x4x290xf32, #tpu.memory_space<vmem>>, vector<1x4x256xf32>
    %57 = vector.shape_cast %56 : vector<1x4x256xf32> to vector<4x256xf32>
    %c7 = arith.constant 7 : index
    %c0_46 = arith.constant 0 : index
    %c0_47 = arith.constant 0 : index
    %58 = vector.load %arg2[%c7, %c0_46, %c0_47] : memref<9x8x4xf32, #tpu.memory_space<vmem>>, vector<1x8x4xf32>
    %59 = vector.shape_cast %58 : vector<1x8x4xf32> to vector<8x4xf32>
    %cst_48 = arith.constant dense<0.000000e+00> : vector<8x256xf32>
    %60 = tpu.matmul %59, %57, %cst_48 {dimension_numbers = #tpu.dot_dimension_numbers<[1], [0], [0], [1], [0, 0, 1, 1], [], []>} : vector<8x4xf32>, vector<4x256xf32>, vector<8x256xf32> -> vector<8x256xf32>
    %61 = arith.addf %55, %60 : vector<8x256xf32>
    %c0_49 = arith.constant 0 : index
    %c0_50 = arith.constant 0 : index
    %c34 = arith.constant 34 : index
    %62 = vector.load %arg1[%c0_49, %c0_50, %c34] : memref<1x4x290xf32, #tpu.memory_space<vmem>>, vector<1x4x256xf32>
    %63 = vector.shape_cast %62 : vector<1x4x256xf32> to vector<4x256xf32>
    %64 = vector.broadcast %2 : vector<1x256xf32> to vector<4x256xf32>
    %65 = arith.mulf %63, %64 : vector<4x256xf32>
    %c8 = arith.constant 8 : index
    %c0_51 = arith.constant 0 : index
    %c0_52 = arith.constant 0 : index
    %66 = vector.load %arg2[%c8, %c0_51, %c0_52] : memref<9x8x4xf32, #tpu.memory_space<vmem>>, vector<1x8x4xf32>
    %67 = vector.shape_cast %66 : vector<1x8x4xf32> to vector<8x4xf32>
    %cst_53 = arith.constant dense<0.000000e+00> : vector<8x256xf32>
    %68 = tpu.matmul %67, %65, %cst_53 {dimension_numbers = #tpu.dot_dimension_numbers<[1], [0], [0], [1], [0, 0, 1, 1], [], []>} : vector<8x4xf32>, vector<4x256xf32>, vector<8x256xf32> -> vector<8x256xf32>
    %69 = arith.addf %61, %68 : vector<8x256xf32>
    %70 = vector.broadcast %0 : vector<8x1xf32> to vector<8x256xf32>
    %71 = arith.addf %69, %70 : vector<8x256xf32>
    %72 = arith.negf %71 : vector<8x256xf32>
    %73 = math.exp %72 : vector<8x256xf32>
    %cst_54 = arith.constant 1.000000e+00 : f32
    %74 = vector.broadcast %cst_54 : f32 to vector<8x256xf32>
    %75 = arith.addf %74, %73 : vector<8x256xf32>
    %76 = arith.divf %74, %75 : vector<8x256xf32>
    %c0_55 = arith.constant 0 : index
    %c0_56 = arith.constant 0 : index
    %c0_57 = arith.constant 0 : index
    %77 = vector.load %arg6[%c0_55, %c0_56, %c0_57] : memref<1x8x256xf32, #tpu.memory_space<vmem>>, vector<1x8x256xf32>
    %78 = vector.shape_cast %77 : vector<1x8x256xf32> to vector<8x256xf32>
    %79 = vector.shape_cast %76 : vector<8x256xf32> to vector<1x8x256xf32>
    tpu.vector_store %arg6[%c0_55, %c0_56, %c0_57], %79 {strides = array<i32>} : memref<1x8x256xf32, #tpu.memory_space<vmem>>, vector<1x8x256xf32>,
    return
  }
  func.func @transform_0(%arg0: i32) -> (i32, i32, i32) {
    %c0_i32 = arith.constant 0 : i32
    %c0_i32_0 = arith.constant 0 : i32
    %c0_i32_1 = arith.constant 0 : i32
    return %arg0, %c0_i32, %c0_i32_0 : i32, i32, i32
  }
  func.func @transform_1(%arg0: i32) -> (i32, i32, i32) {
    %c0_i32 = arith.constant 0 : i32
    %c0_i32_0 = arith.constant 0 : i32
    %c0_i32_1 = arith.constant 0 : i32
    %c0_i32_2 = arith.constant 0 : i32
    return %c0_i32, %c0_i32_0, %c0_i32_1 : i32, i32, i32
  }
  func.func @transform_2(%arg0: i32) -> (i32, i32) {
    %c0_i32 = arith.constant 0 : i32
    %c0_i32_0 = arith.constant 0 : i32
    %c0_i32_1 = arith.constant 0 : i32
    return %c0_i32, %c0_i32_0 : i32, i32
  }
  func.func @transform_3(%arg0: i32) -> (i32, i32) {
    %c0_i32 = arith.constant 0 : i32
    %c0_i32_0 = arith.constant 0 : i32
    %c0_i32_1 = arith.constant 0 : i32
    return %c0_i32, %c0_i32_0 : i32, i32
  }
  func.func @transform_4(%arg0: i32) -> (i32, i32) {
    %c0_i32 = arith.constant 0 : i32
    %c0_i32_0 = arith.constant 0 : i32
    %c0_i32_1 = arith.constant 0 : i32
    return %c0_i32, %c0_i32_0 : i32, i32
  }
  func.func @transform_5(%arg0: i32) -> (i32, i32, i32) {
    %c0_i32 = arith.constant 0 : i32
    %c0_i32_0 = arith.constant 0 : i32
    %c0_i32_1 = arith.constant 0 : i32
    return %arg0, %c0_i32, %c0_i32_0 : i32, i32, i32
  }
}

</mosaic_0001>

<bundles_post_ra>
// kernel: tpu_custom_call.1
= control target key start
LH: loop header
LB: loop body
LE: loop exit
PB: predicated region body
PF: predicated region fallthrough
CT: control target
= control target key end

     0   :  { %10 = vsyncpa [#allocation3], 0  ;;  %s1433_s0 = inlined_call_operand.vmem [shape: f32[2,4,290], index: 0, kind: input, shape index: {}]   ;;  %s1434_s1 = inlined_call_operand.vmem [shape: f32[9,8,4], index: 1, kind: input, shape index: {}]   ;;  %s1435_s2 = inlined_call_operand.vmem [shape: f32[8,1], index: 2, kind: input, shape index: {}]   ;;  %s1436_s3 = inlined_call_operand.vmem [shape: f32[1,256], index: 3, kind: input, shape index: {}]   ;;  %s1437_s4 = inlined_call_operand.vmem [shape: f32[1,256], index: 4, kind: input, shape index: {}]   ;;  %s1438_s5 = inlined_call_operand.hbm [shape: f32[2,8,256], index: 5, kind: output, shape index: {}]  }
   0x1   :  { %12 = vsyncpa [#allocation3 + $0x1], 0  ;;  %s1248_s18 = smov 0   ;;  %s1250_s19 = smov 0  }
   0x2   :  { %s1252_s20 = smov 0   ;;  %s1254_s21 = smov 0  }
   0x3 LB: > { %s1269_s22 = sadd.s32 4294967295, %s1202_s21   ;;  %s1018_s23 = sadd.s32 4294967294, %s1202_s21   ;;  %s1202_s21 = sphi %s1254_s21, %s1444_s21   ;;  %s1198_s20 = sphi %s1252_s20, %s1443_s20   ;;  %s1194_s19 = sphi %s1250_s19, %s1442_s19   ;;  %s1190_s18 = sphi %s1248_s18, %s1441_s18  }
   0x4   : > { %s1273_s24 = sadd.s32 1, %s1202_s21   ;;  %s135_s25 = sadd.s32 1, %s1198_s20 }
   0x5   : > { %s132_s26 = ssub.s32 %s1202_s21, %s1273_s24  ;;  %p145_p0 = scmp.ne.s32.totalorder %s1198_s20, %s1194_s19 }
   0x6   : > { %p133_p1 = scmp.eq.s32.totalorder %s132_s26, 0  ;;  %p146_p2 = scmp.eq.s32.totalorder %s1269_s22, 1 }
   0x7   : > { %p151_p3 = scmp.ne.s32.totalorder %s1194_s19, %s1190_s18  ;;  %p152_p4 = scmp.eq.s32.totalorder %s1018_s23, 1 }
   0x8   : > { %s1284_s27 = scalar_select %p133_p1, %s1198_s20, %s135_s25  }
   0x9   : > { %p1286_p5 = por %p146_p2, %p145_p0  ;;  %p1290_p6 = por %p152_p4, %p151_p3 }
   0xa   : > { %p1021_p7 = scmp.ge.s32.totalorder %s1202_s21, 1  ;;  %p190_p8 = scmp.lt.s32.totalorder %s1202_s21, 3 }
   0xc   : > { %p191_p9 = pnand %p1021_p7, %p190_p8 }
   0xd   : > { %p218_p10 = scmp.lt.s32.totalorder (!%p191_p9), %s1269_s22, 1  ;;  %s1204_s11 = smov (!%p191_p9), 2  }
   0xe   : > { %194 = sbr.rel (%p191_p9) target bundleno = 481 (0x1e1), region = 40  ;;  %s1205_s12 = smov (!%p191_p9), 18  }
   0xf   : > { %s1206_s16 = smov (!%p191_p9), 34   ;;  %s1207_s17 = smov (!%p191_p9), 16  }
  0x10   : > { %s1208_s23 = smov (!%p191_p9), 32   ;;  %s1209_s25 = smov (!%p191_p9), 127  }
  0x11   : > { %s1210_s26 = smov (!%p191_p9), 126   ;;  %s1211_s30 = smov (!%p191_p9), 112  }
  0x12   : > { %s1212_s6 = smov (!%p191_p9), 111   ;;  %s1213_s7 = smov (!%p191_p9), 110  }
  0x13   : > { %v225_v0 = vld [vmem:[%s1437_s4] sm:$0x3]  ;;  %vm231_vm0 = vcmask 1043456   ;;  %s219_s9 = scalar_select %p218_p10, %s1269_s22, 1  ;;  %vm365_vm1 = vcmask 15360   ;;  %vm444_vm2 = vcmask 130048  }
  0x14   : > { %v224_v1 = vld [vmem:[%s1436_s3] sm:$0x3]  ;;  %v358_v2 = vperm.slane %v225_v0, 0  ;;  %v359_v3 = vperm.slane %v225_v0, 1  ;;  %vm593_vm3 = vcmask 146432   ;;  %vm672_vm4 = vcmask 261120  }
  0x15   : > { %v229_v5 = vperm.slane %v224_v1, 1  ;;  %s1076_s10 = smul.u32 12, %s219_s9  ;;  %v228_v7 = vperm.slane %v224_v1, 0  ;;  %s1214_s8 = smov 96   ;;  %vm821_vm5 = vcmask 277504   ;;  %vm253_vm6 = vcmask 1039360  }
  0x16   : > { %v360_v4 = vrot.slane %v359_v3, 4  ;;  %s1215_s9 = smov 95   ;;  %vm256_vm7 = vcmask 31744   ;;  %vm387_vm8 = vcmask 1031168   ;;  %vm466_vm9 = vcmask 916480  }
  0x17   : > { %v230_v8 = vrot.slane %v229_v5, 4  ;;  %s1308_s15 = scalar_lea.vmem %s1433_s0, %s1076_s10  ;;  %s1216_s10 = smov 94   ;;  %vm536_vm10 = vcmask 908288   ;;  %vm615_vm11 = vcmask 900096   ;;  %vm694_vm12 = vcmask 785408  }
  0x18   : > { %v361_v6 = vsel %vm231_vm0, %v358_v2, %v360_v4  ;;  %v1311_v9 = vld [vmem:[%s1308_s15] sm:$0xff]  ;;  %v236_v14 = vld [vmem:[%s1308_s15 + $0x8] sm:$0xf]  ;;  %vm764_vm13 = vcmask 777216   ;;  %vm843_vm14 = vcmask 769024  }
  0x19   : > { %362 = vrot.lane.b32.xlu0 %v361_v6, %s1204_s11  ;;  %590 = vrot.lane.b32.xlu1 %v361_v6, %s1205_s12  ;;  %241 = vst [vmem:[#allocation1] ss:$2 sm:$0xff] %v1311_v9  ;;  %v232_v10 = vsel %vm231_vm0, %v228_v7, %v230_v8  ;;  %v356_v19 = vld [vmem:[%s1308_s15 + $0x8] sm:$0xf]  ;;  %s1160_s12 = scalar_lea.hbm %s1438_s5, 32 }
  0x1a   : > { %818 = vrot.lane.b32.xlu2 %v361_v6, %s1206_s16  ;;  %v234_v11 = vmul.f32 %v232_v10, %v1311_v9  ;;  %243 = vst [vmem:[#allocation1 + $0x10] ss:$2 sm:$0xff] %v236_v14  ;;  %v440_v25 = vld [vmem:[%s1308_s15 + $0x8] sm:$0xf] }
  0x1b   : > { %v519_v34 = vld [vmem:[%s1308_s15 + $0x8] sm:$0xf] }
  0x1c   : > { %v589_v36 = vld [vmem:[%s1308_s15 + $0x8] sm:$0xf] }
  0x1d   : > { %v668_v45 = vld [vmem:[%s1308_s15 + $0x8] sm:$0xf] }
  0x1e   : > { %v747_v55 = vld [vmem:[%s1308_s15 + $0x8] sm:$0xf] }
  0x1f   : > { %v817_v58 = vld [vmem:[%s1308_s15 + $0x8] sm:$0xf]  ;;  %s215_s15 = sand.u32 1, %s1194_s19  }
  0x20   : > { %v244_v12 = vld.sshfl [vmem:[#allocation1] sm:$0xff pattern:$0x75316420]  ;;  %v245_v13 = vld.sshfl [vmem:[#allocation1 + $0x8] sm:$0xff pattern:$0x75316420] }
  0x21   : > { %441 = vrot.lane.b32.xlu0 %v232_v10, %s1207_s17  ;;  %669 = vrot.lane.b32.xlu1 %v232_v10, %s1208_s23  ;;  %305 = vst [vmem:[#allocation1] ss:$2 sm:$0xff] %v234_v11  ;;  %v246_v17 = vld.sshfl [vmem:[#allocation1 + $0x10] sm:$0xff pattern:$0x75316420]  ;;  %s1022_s16 = sshll.u32 %s215_s15, 4 }
  0x22   : > { %247 = vrot.lane.b32.xlu2 %v244_v12, %s1209_s25  ;;  %v1024_v12 = vld [vmem:[%s1434_s1 + $0x8] sm:$0xff]  ;;  %s1075_s17 = sshll.u32 %s1269_s22, 4 }
  0x28   : > { %v306_v15 = vld.sshfl [vmem:[#allocation1] sm:$0xff pattern:$0x75316420]  ;;  %v307_v16 = vld.sshfl [vmem:[#allocation1 + $0x8] sm:$0xff pattern:$0x75316420] }
  0x29   : > { %249 = vrot.lane.b32.xlu0 %v245_v13, %s1209_s25  ;;  %1029 = vmatpush.msk.msra.mxu2 %vm231_vm0, %v306_v15  ;;  %v235_v13 = vld [vmem:[%s1434_s1] sm:$0xff] }
  0x2a   : > { %1031 = vmatpush.msk.msra.mxu3 %vm231_vm0, %v307_v16  ;;  %251 = vrot.lane.b32.xlu1 %v246_v17, %s1209_s25 }
  0x2b   : > { %1030 = vmatmul.msk.f32.vlgmr.msra.gmra.mxu2 %vm256_vm7, %v235_v13  ;;  %1032 = vmatmul.msk.f32.vlgmr.msra.gmra.mxu3 %vm256_vm7, %v235_v13 }
  0x74   : > { %v819_v56 = vpop.permute.xlu2 %818 }
  0x75   : > { %v820_v59 = vrot.slane %v819_v56, 4 }
  0x77   : > { %v826_v62 = vmul.f32 %v820_v59, %v817_v58  ;;  %v822_v63 = vsel %vm821_vm5, %v820_v59, %v819_v56 }
  0x78   : > { %v825_v1 = vmul.f32 %v822_v63, %v1311_v9 }
  0x7c   : > { %v248_v10 = vpop.permute.xlu2 %247 }
  0x8b   : > { %v363_v18 = vpop.permute.xlu0 %362  ;;  %v591_v33 = vpop.permute.xlu1 %590 }
  0x8c   : > { %v364_v20 = vrot.slane %v363_v18, 4  ;;  %v592_v37 = vrot.slane %v591_v33, 4 }
  0x8e   : > { %v366_v21 = vsel %vm365_vm1, %v364_v20, %v363_v18  ;;  %v370_v22 = vmul.f32 %v364_v20, %v356_v19  ;;  %v598_v40 = vmul.f32 %v592_v37, %v589_v36  ;;  %v594_v41 = vsel %vm593_vm3, %v592_v37, %v591_v33  ;;  %v1033_v18 = vld [vmem:[%s1434_s1 + $0x10] sm:$0xff]  ;;  %v223_v33 = vld [vmem:[%s1435_s2] sm:$0xff]  ;;  %v1048_v37 = vld [vmem:[%s1434_s1 + $0x28] sm:$0xff] }
  0x8f   : > { %v369_v23 = vmul.f32 %v366_v21, %v1311_v9  ;;  %v597_v44 = vmul.f32 %v594_v41, %v1311_v9 }
  0x90   : > { %377 = vst [vmem:[#allocation1 + $0x10] ss:$2 sm:$0xff] %v370_v22 }
  0x91   : > { %375 = vst [vmem:[#allocation1] ss:$2 sm:$0xff] %v369_v23 }
  0x93   : > { %v442_v24 = vpop.permute.xlu0 %441  ;;  %v670_v42 = vpop.permute.xlu1 %669 }
  0x94   : > { %v443_v26 = vrot.slane %v442_v24, 4  ;;  %v671_v46 = vrot.slane %v670_v42, 4 }
  0x96   : > { %v445_v27 = vsel %vm444_vm2, %v443_v26, %v442_v24  ;;  %v449_v28 = vmul.f32 %v443_v26, %v440_v25  ;;  %v677_v49 = vmul.f32 %v671_v46, %v668_v45  ;;  %v673_v50 = vsel %vm672_vm4, %v671_v46, %v670_v42  ;;  %v1038_v24 = vld [vmem:[%s1434_s1 + $0x18] sm:$0xff] }
  0x97   : > { %v380_v29 = vld.sshfl [vmem:[#allocation1 + $0x10] sm:$0xff pattern:$0x75316420]  ;;  %v448_v30 = vmul.f32 %v445_v27, %v1311_v9  ;;  %v676_v52 = vmul.f32 %v673_v50, %v1311_v9 }
  0x98   : > { %456 = vst [vmem:[#allocation1 + $0x10] ss:$2 sm:$0xff] %v449_v28  ;;  %385 = vrot.lane.b32.xlu1 %v380_v29, %s1210_s26  ;;  %v379_v31 = vld.sshfl [vmem:[#allocation1 + $0x8] sm:$0xff pattern:$0x75316420]  ;;  %v1043_v29 = vld [vmem:[%s1434_s1 + $0x20] sm:$0xff] }
  0x99   : > { %383 = vrot.lane.b32.xlu0 %v379_v31, %s1210_s26  ;;  %v378_v32 = vld.sshfl [vmem:[#allocation1] sm:$0xff pattern:$0x75316420] }
  0x9a   : > { %381 = vrot.lane.b32.xlu2 %v378_v32, %s1210_s26  ;;  %454 = vst [vmem:[#allocation1] ss:$2 sm:$0xff] %v448_v30  ;;  %s954_s26 = scalar_lea.hbm %s1438_s5, %s1075_s17 }
  0x9b   : > { %v250_v8 = vpop.permute.xlu0 %249  ;;  %s958_s22 = sshll.u32 %s954_s26, 4  ;;  %s959_s22 = int_to_ptr.hbm [resolvable:$true] %s958_s22 }
  0x9c   : > { %v252_v7 = vpop.permute.xlu1 %251 }
  0x9d   : > { %v255_v11 = vsel %vm253_vm6, %v250_v8, %v252_v7 }
  0x9e   : > { %1027 = vmatpush.msk.msra.mxu1 %vm231_vm0, %v255_v11 }
  0x9f   : > { %v459_v35 = vld.sshfl [vmem:[#allocation1 + $0x10] sm:$0xff pattern:$0x75316420]  ;;  %1028 = vmatmul.msk.f32.vlgmr.msra.gmra.mxu1 %vm256_vm7, %v1024_v12 }
  0xa0   : > { %464 = vrot.lane.b32.xlu1 %v459_v35, %s1211_s30  ;;  %526 = vst [vmem:[#allocation1 + $0x10] ss:$2 sm:$0xff] %v519_v34  ;;  %v1217_v34 = vmov 0  }
  0xa1   : > { %v458_v38 = vld.sshfl [vmem:[#allocation1 + $0x8] sm:$0xff pattern:$0x75316420]  ;;  %v457_v39 = vld.sshfl [vmem:[#allocation1] sm:$0xff pattern:$0x75316420]  ;;  %1130 = vset.pattern.permute.xlu2 %v1217_v34  ;;  %1131 = vset.pattern.permute.xlu0 %v1217_v34 }
  0xa2   : > { %462 = vrot.lane.b32.xlu0 %v458_v38, %s1211_s30  ;;  %460 = vrot.lane.b32.xlu2 %v457_v39, %s1211_s30  ;;  %524 = vst [vmem:[#allocation1] ss:$2 sm:$0xff] %v1311_v9  ;;  %s217_s30 = scalar_lea.vmem [#allocation2], %s1022_s16 }
  0xa7   : > { %v529_v43 = vld.sshfl [vmem:[#allocation1 + $0x10] sm:$0xff pattern:$0x75316420] }
  0xa8   : > { %534 = vrot.lane.b32.xlu1 %v529_v43, %s1212_s6  ;;  %605 = vst [vmem:[#allocation1 + $0x10] ss:$2 sm:$0xff] %v598_v40  ;;  %v1053_v43 = vld [vmem:[%s1434_s1 + $0x30] sm:$0xff] }
  0xa9   : > { %v528_v47 = vld.sshfl [vmem:[#allocation1 + $0x8] sm:$0xff pattern:$0x75316420]  ;;  %v527_v48 = vld.sshfl [vmem:[#allocation1] sm:$0xff pattern:$0x75316420] }
  0xaa   : > { %532 = vrot.lane.b32.xlu0 %v528_v47, %s1212_s6  ;;  %530 = vrot.lane.b32.xlu2 %v527_v48, %s1212_s6  ;;  %603 = vst [vmem:[#allocation1] ss:$2 sm:$0xff] %v597_v44  ;;  %s956_s6 = sshll.u32 %s217_s30, 4  ;;  %s957_s6 = int_to_ptr.vmem [resolvable:$true] %s956_s6 }
  0xaf   : > { %v608_v51 = vld.sshfl [vmem:[#allocation1 + $0x10] sm:$0xff pattern:$0x75316420] }
  0xb0   : > { %613 = vrot.lane.b32.xlu1 %v608_v51, %s1213_s7  ;;  %684 = vst [vmem:[#allocation1 + $0x10] ss:$2 sm:$0xff] %v677_v49  ;;  %v1058_v49 = vld [vmem:[%s1434_s1 + $0x38] sm:$0xff] }
  0xb1   : > { %v607_v53 = vld.sshfl [vmem:[#allocation1 + $0x8] sm:$0xff pattern:$0x75316420]  ;;  %v606_v54 = vld.sshfl [vmem:[#allocation1] sm:$0xff pattern:$0x75316420] }
  0xb2   : > { %611 = vrot.lane.b32.xlu0 %v607_v53, %s1213_s7  ;;  %609 = vrot.lane.b32.xlu2 %v606_v54, %s1213_s7  ;;  %682 = vst [vmem:[#allocation1] ss:$2 sm:$0xff] %v676_v52  ;;  %s943_s7 = scalar_lea.sflag [#allocation3], %s215_s15 }
  0xb7   : > { %v687_v57 = vld.sshfl [vmem:[#allocation1 + $0x10] sm:$0xff pattern:$0x75316420] }
  0xb8   : > { %692 = vrot.lane.b32.xlu1 %v687_v57, %s1214_s8  ;;  %754 = vst [vmem:[#allocation1 + $0x10] ss:$2 sm:$0xff] %v747_v55  ;;  %v1063_v55 = vld [vmem:[%s1434_s1 + $0x40] sm:$0xff] }
  0xb9   : > { %v686_v60 = vld.sshfl [vmem:[#allocation1 + $0x8] sm:$0xff pattern:$0x75316420]  ;;  %v685_v61 = vld.sshfl [vmem:[#allocation1] sm:$0xff pattern:$0x75316420] }
  0xba   : > { %690 = vrot.lane.b32.xlu0 %v686_v60, %s1214_s8  ;;  %688 = vrot.lane.b32.xlu2 %v685_v61, %s1214_s8  ;;  %752 = vst [vmem:[#allocation1] ss:$2 sm:$0xff] %v1311_v9  ;;  %v254_v9 = vsel %vm253_vm6, %v248_v10, %v250_v8  ;;  %v332_v60 = vpop.f32.mrf.mxu2  ;;  %v352_v61 = vpop.f32.mrf.mxu3  ;;  %s1154_s8 = sshra.s32 %s959_s22, 4  ;;  %s1155_s8 = int_to_ptr.hbm [resolvable:$true] %s1154_s8 }
  0xbb   : > { %1025 = vmatpush.msk.msra.mxu0 %vm231_vm0, %v254_v9  ;;  %p1161_p0 = scmp.lt.s32.totalorder %s1155_s8, %s1438_s5 }
  0xbc   : > { %1026 = vmatmul.msk.f32.vlgmr.msra.gmra.mxu0 %vm256_vm7, %v1024_v12 }
  0xbf   : > { %v757_v0 = vld.sshfl [vmem:[#allocation1 + $0x10] sm:$0xff pattern:$0x75316420] }
  0xc0   : > { %762 = vrot.lane.b32.xlu1 %v757_v0, %s1215_s9  ;;  %833 = vst [vmem:[#allocation1 + $0x10] ss:$2 sm:$0xff] %v826_v62 }
  0xc1   : > { %v756_v2 = vld.sshfl [vmem:[#allocation1 + $0x8] sm:$0xff pattern:$0x75316420]  ;;  %v755_v3 = vld.sshfl [vmem:[#allocation1] sm:$0xff pattern:$0x75316420] }
  0xc2   : > { %760 = vrot.lane.b32.xlu0 %v756_v2, %s1215_s9  ;;  %758 = vrot.lane.b32.xlu2 %v755_v3, %s1215_s9  ;;  %831 = vst [vmem:[#allocation1] ss:$2 sm:$0xff] %v825_v1  ;;  %s1156_s9 = scalar_lea.hbm %s1155_s8, 16 }
  0xc3   : > { %p1157_p11 = scmp.ne.s32.totalorder %s1155_s8, %s1156_s9  ;;  %p1162_p1 = scmp.lt.s32.totalorder %s1160_s12, %s1156_s9 }
  0xc5   : > { %p1158_p12 = pnand %p1157_p11, %p1286_p5  ;;  %p1163_p2 = por %p1162_p1, %p1161_p0 }
  0xc7   : > { %v836_v4 = vld.sshfl [vmem:[#allocation1 + $0x10] sm:$0xff pattern:$0x75316420]  ;;  %p1159_p13 = pneg %p1158_p12 }
  0xc8   : > { %841 = vrot.lane.b32.xlu1 %v836_v4, %s1216_s10 }
  0xc9   : > { %v835_v5 = vld.sshfl [vmem:[#allocation1 + $0x8] sm:$0xff pattern:$0x75316420]  ;;  %v834_v6 = vld.sshfl [vmem:[#allocation1] sm:$0xff pattern:$0x75316420]  ;;  %p1164_p3 = pnand %p1163_p2, %p1159_p13 }
  0xca   : > { %839 = vrot.lane.b32.xlu0 %v835_v5, %s1216_s10  ;;  %837 = vrot.lane.b32.xlu2 %v834_v6, %s1216_s10 }
  0xd2   : > { %897 = vperm.xlu2 %1130, %v223_v33  }
  0xf4   : > { %v382_v14 = vpop.permute.xlu2 %381 }
  0xfc   : > { %v461_v15 = vpop.permute.xlu2 %460 }
 0x104   : > { %v531_v22 = vpop.permute.xlu2 %530 }
 0x10a   : > { %v386_v16 = vpop.permute.xlu1 %385 }
 0x10b   : > { %v384_v17 = vpop.permute.xlu0 %383 }
 0x10c   : > { %v388_v19 = vsel %vm387_vm8, %v382_v14, %v384_v17  ;;  %v389_v20 = vsel %vm387_vm8, %v384_v17, %v386_v16  ;;  %v610_v32 = vpop.permute.xlu2 %609 }
 0x10d   : > { %1034 = vmatpush.msk.msrb.mxu0 %vm231_vm0, %v388_v19  ;;  %1036 = vmatpush.msk.msrb.mxu1 %vm231_vm0, %v389_v20 }
 0x10e   : > { %1035 = vmatmul.msk.f32.vlgmr.msrb.gmra.mxu0 %vm256_vm7, %v1033_v18  ;;  %1037 = vmatmul.msk.f32.vlgmr.msrb.gmra.mxu1 %vm256_vm7, %v1033_v18 }
 0x112   : > { %v465_v21 = vpop.permute.xlu1 %464 }
 0x114   : > { %v463_v23 = vpop.permute.xlu0 %462  ;;  %v689_v40 = vpop.permute.xlu2 %688 }
 0x115   : > { %v467_v25 = vsel %vm466_vm9, %v461_v15, %v463_v23  ;;  %v468_v26 = vsel %vm466_vm9, %v463_v23, %v465_v21 }
 0x116   : > { %1039 = vmatpush.msk.msrb.mxu2 %vm231_vm0, %v467_v25  ;;  %1041 = vmatpush.msk.msrb.mxu3 %vm231_vm0, %v468_v26 }
 0x117   : > { %1040 = vmatmul.msk.f32.vlgmr.msrb.gmra.mxu2 %vm256_vm7, %v1038_v24  ;;  %1042 = vmatmul.msk.f32.vlgmr.msrb.gmra.mxu3 %vm256_vm7, %v1038_v24 }
 0x11a   : > { %v535_v27 = vpop.permute.xlu1 %534 }
 0x11c   : > { %v533_v28 = vpop.permute.xlu0 %532  ;;  %v759_v46 = vpop.permute.xlu2 %758 }
 0x11d   : > { %v537_v30 = vsel %vm536_vm10, %v531_v22, %v533_v28  ;;  %v538_v31 = vsel %vm536_vm10, %v533_v28, %v535_v27  ;;  %v301_v59 = vpop.f32.mrf.mxu1 }
 0x11e   : > { %1044 = vmatpush.msk.msra.mxu0 %vm231_vm0, %v537_v30  ;;  %1046 = vmatpush.msk.msra.mxu1 %vm231_vm0, %v538_v31  ;;  %v353_v1 = vadd.f32 %v352_v61, %v301_v59 }
 0x11f   : > { %1045 = vmatmul.msk.f32.vlgmr.msra.gmra.mxu0 %vm256_vm7, %v1043_v29  ;;  %1047 = vmatmul.msk.f32.vlgmr.msra.gmra.mxu1 %vm256_vm7, %v1043_v29 }
 0x122   : > { %v614_v35 = vpop.permute.xlu1 %613 }
 0x124   : > { %v612_v36 = vpop.permute.xlu0 %611  ;;  %v838_v53 = vpop.permute.xlu2 %837 }
 0x125   : > { %v616_v38 = vsel %vm615_vm11, %v610_v32, %v612_v36  ;;  %v617_v39 = vsel %vm615_vm11, %v612_v36, %v614_v35 }
 0x126   : > { %1049 = vmatpush.msk.msra.mxu2 %vm231_vm0, %v616_v38  ;;  %1051 = vmatpush.msk.msra.mxu3 %vm231_vm0, %v617_v39 }
 0x127   : > { %1050 = vmatmul.msk.f32.vlgmr.msra.gmra.mxu2 %vm256_vm7, %v1048_v37  ;;  %1052 = vmatmul.msk.f32.vlgmr.msra.gmra.mxu3 %vm256_vm7, %v1048_v37 }
 0x12a   : > { %v693_v41 = vpop.permute.xlu1 %692 }
 0x12c   : > { %v691_v42 = vpop.permute.xlu0 %690  ;;  %v898_v24 = vpop.permute.xlu2 %897 }
 0x12d   : > { %v695_v44 = vsel %vm694_vm12, %v689_v40, %v691_v42  ;;  %v696_v45 = vsel %vm694_vm12, %v691_v42, %v693_v41 }
 0x12e   : > { %1054 = vmatpush.msk.msrb.mxu0 %vm231_vm0, %v695_v44  ;;  %1056 = vmatpush.msk.msrb.mxu1 %vm231_vm0, %v696_v45 }
 0x12f   : > { %1055 = vmatmul.msk.f32.vlgmr.msrb.gmra.mxu0 %vm256_vm7, %v1053_v43  ;;  %1057 = vmatmul.msk.f32.vlgmr.msrb.gmra.mxu1 %vm256_vm7, %v1053_v43 }
 0x132   : > { %v763_v47 = vpop.permute.xlu1 %762 }
 0x134   : > { %v761_v48 = vpop.permute.xlu0 %760 }
 0x135   : > { %v765_v50 = vsel %vm764_vm13, %v759_v46, %v761_v48  ;;  %v766_v51 = vsel %vm764_vm13, %v761_v48, %v763_v47 }
 0x136   : > { %1059 = vmatpush.msk.msrb.mxu2 %vm231_vm0, %v765_v50  ;;  %1061 = vmatpush.msk.msrb.mxu3 %vm231_vm0, %v766_v51 }
 0x137   : > { %1060 = vmatmul.msk.f32.vlgmr.msrb.gmra.mxu2 %vm256_vm7, %v1058_v49  ;;  %1062 = vmatmul.msk.f32.vlgmr.msrb.gmra.mxu3 %vm256_vm7, %v1058_v49 }
 0x139   : > { %v281_v58 = vpop.f32.mrf.mxu0 }
 0x13a   : > { %v842_v52 = vpop.permute.xlu1 %841  ;;  %v333_v0 = vadd.f32 %v332_v60, %v281_v58 }
 0x13c   : > { %v840_v54 = vpop.permute.xlu0 %839 }
 0x13d   : > { %v844_v56 = vsel %vm843_vm14, %v838_v53, %v840_v54  ;;  %v845_v57 = vsel %vm843_vm14, %v840_v54, %v842_v52 }
 0x13e   : > { %1064 = vmatpush.msk.msra.mxu0 %vm231_vm0, %v844_v56  ;;  %1066 = vmatpush.msk.msra.mxu1 %vm231_vm0, %v845_v57 }
 0x13f   : > { %1065 = vmatmul.msk.f32.vlgmr.msra.gmra.mxu0 %vm256_vm7, %v1063_v55  ;;  %1067 = vmatmul.msk.f32.vlgmr.msra.gmra.mxu1 %vm256_vm7, %v1063_v55 }
 0x18b   : > { %v414_v62 = vpop.f32.mrf.mxu0  ;;  %v434_v63 = vpop.f32.mrf.mxu1 }
 0x18c   : > { %v437_v4 = vadd.f32 %v414_v62, %v333_v0  ;;  %v438_v5 = vadd.f32 %v434_v63, %v353_v1 }
 0x19a   : > { %v493_v2 = vpop.f32.mrf.mxu2  ;;  %v513_v3 = vpop.f32.mrf.mxu3 }
 0x19b   : > { %v516_v8 = vadd.f32 %v493_v2, %v437_v4  ;;  %v517_v10 = vadd.f32 %v513_v3, %v438_v5 }
 0x19c   : > { %v563_v6 = vpop.f32.mrf.mxu0  ;;  %v583_v7 = vpop.f32.mrf.mxu1 }
 0x19d   : > { %v586_v12 = vadd.f32 %v563_v6, %v516_v8  ;;  %v587_v13 = vadd.f32 %v583_v7, %v517_v10 }
 0x1aa   : > { %v642_v9 = vpop.f32.mrf.mxu2  ;;  %v662_v11 = vpop.f32.mrf.mxu3 }
 0x1ab   : > { %v665_v16 = vadd.f32 %v642_v9, %v586_v12  ;;  %v666_v17 = vadd.f32 %v662_v11, %v587_v13 }
 0x1ac   : > { %v721_v14 = vpop.f32.mrf.mxu0  ;;  %v741_v15 = vpop.f32.mrf.mxu1 }
 0x1ad   : > { %v744_v18 = vadd.f32 %v721_v14, %v665_v16  ;;  %v745_v19 = vadd.f32 %v741_v15, %v666_v17 }
 0x1ba   : > { %v791_v20 = vpop.f32.mrf.mxu2  ;;  %v811_v21 = vpop.f32.mrf.mxu3 }
 0x1bb   : > { %v814_v22 = vadd.f32 %v791_v20, %v744_v18  ;;  %v815_v23 = vadd.f32 %v811_v21, %v745_v19 }
 0x1bc   : > { %v870_v25 = vpop.f32.mrf.mxu0  ;;  %v890_v26 = vpop.f32.mrf.mxu1 }
 0x1bd   : > { %v893_v27 = vadd.f32 %v870_v25, %v814_v22  ;;  %v894_v28 = vadd.f32 %v890_v26, %v815_v23 }
 0x1bf   : > { %v900_v29 = vadd.f32 %v898_v24, %v893_v27  ;;  %v901_v30 = vadd.f32 %v898_v24, %v894_v28 }
 0x1c1   : > { %v1068_v31 = vmul.f32 -1.442695, %v900_v29  ;;  %v1069_v32 = vmul.f32 -1.442695, %v901_v30 }
 0x1c3   : > { %1132 = vpow2.f32 %v1068_v31 }
 0x1c4   : > { %1134 = vpow2.f32 %v1069_v32 }
 0x1c9   : > { %v1133_v33 = vpop.eup %1132 }
 0x1ca   : > { %v1135_v34 = vpop.eup %1134  ;;  %v908_v35 = vadd.f32 1.0, %v1133_v33 }
 0x1cb   : > { %v909_v36 = vadd.f32 1.0, %v1135_v34 }
 0x1cc   : > { %1136 = vrcp.f32 %v908_v35  ;;  %v921_v43 = vand.u32 2147483648, %v908_v35  ;;  %v919_v45 = vand.u32 2147483647, %v908_v35  ;;  %vm915_vm1 = vweird.f32 %v908_v35 }
 0x1cd   : > { %1138 = vrcp.f32 %v909_v36  ;;  %v936_v46 = vand.u32 2147483648, %v909_v36  ;;  %v934_v48 = vand.u32 2147483647, %v909_v36  ;;  %vm930_vm3 = vweird.f32 %v909_v36 }
 0x1ce   : > { %v922_v50 = vor.u32 1.1754944e-38, %v921_v43  ;;  %vm920_vm4 = vcmp.eq.f32.partialorder %v919_v45, 8.507059e+37 }
 0x1cf   : > { %v937_v53 = vor.u32 1.1754944e-38, %v936_v46  ;;  %vm935_vm6 = vcmp.eq.f32.partialorder %v934_v48, 8.507059e+37 }
 0x1d2   : > { %v1137_v37 = vpop.eup %1136 }
 0x1d3   : > { %v1139_v38 = vpop.eup %1138  ;;  %v911_v39 = vmul.f32 %v1137_v37, %v908_v35  ;;  %vm916_vm15 = vweird.f32 %v1137_v37 }
 0x1d4   : > { %v926_v40 = vmul.f32 %v1139_v38, %v909_v36  ;;  %vm931_vm0 = vweird.f32 %v1139_v38  ;;  %vm917_vm2 = vmor %vm915_vm1, %vm916_vm15 }
 0x1d5   : > { %v912_v41 = vsub.f32 1.0, %v911_v39  ;;  %vm932_vm5 = vmor %vm930_vm3, %vm931_vm0 }
 0x1d6   : > { %v927_v42 = vsub.f32 1.0, %v926_v40 }
 0x1d7   : > { %v913_v44 = vmul.f32 %v1137_v37, %v912_v41 }
 0x1d8   : > { %v928_v47 = vmul.f32 %v1139_v38, %v927_v42 }
 0x1d9   : > { %v914_v49 = vadd.f32 %v1137_v37, %v913_v44 }
 0x1da   : > { %v929_v51 = vadd.f32 %v1139_v38, %v928_v47 }
 0x1db   : > { %v918_v52 = vsel %vm917_vm2, %v1137_v37, %v914_v49 }
 0x1dc   : > { %v923_v54 = vsel %vm920_vm4, %v922_v50, %v918_v52  ;;  %v933_v55 = vsel %vm932_vm5, %v1139_v38, %v929_v51 }
 0x1dd   : > { %v938_v56 = vsel %vm935_vm6, %v937_v53, %v933_v55  ;;  %940 = vst [vmem:[%s217_s30] sm:$0xff] %v923_v54 }
 0x1de   : > { %941 = vst [vmem:[%s217_s30 + $0x8] sm:$0xff] %v938_v56 }
 0x1df   : > { %1167 = shalt.err (!%p1164_p3)
}
 0x1e0   : > { %1077 = dma.vmem_to_hbm [thread:$0]  (%p1286_p5), %s957_s6, 256, %s959_s22, %s943_s7  }
 0x1e1 PF: > { %p1083_p4 = scmp.ge.s32.totalorder %s1202_s21, 2  ;;  %s970_s15 = sand.u32 1, %s1190_s18  }
 0x1e2   : > { %s971_s16 = scalar_lea.sflag [#allocation3], %s970_s15 }
 0x1e3   : > { %p1080_p7 = pnand %p1083_p4, %p1290_p6 }
 0x1e5   : > { %p1081_p8 = pneg %p1080_p7 }
 0x1e7   : > { %1185 = dma.done.wait (%p1081_p8), %s971_s16, 256  }
 0x1e8   : > { %1187 = vsyncadd (%p1081_p8), %s971_s16, 4294967040  ;;  %p15_p9 = scmp.ge.s32.totalorder %s1273_s24, 4   ;;  %s1441_s18 = smov %s1194_s19 }
 0x1e9   : > { %s1442_s19 = smov %s1198_s20  ;;  %s1443_s20 = smov %s1284_s27 }
 0x1ea   : > { %s1444_s21 = smov %s1273_s24  ;;  %17 = sbr.rel (!%p15_p9) target bundleno = 3 (0x3), region = 91 }
 0x1ef   :  { %977 = vsyncpa [#allocation3], 1 }
 0x1f0   :  { %979 = vsyncpa [#allocation3 + $0x1], 1 }

</bundles_post_ra>
